<compile_context>
chip_gen: v7x
topology: tpu7x:2x2x1
jax: 0.10.0
libtpu: 0.0.40
codegen_flags: <defaults>
</compile_context>

<pallas_src>
import jax
import jax.numpy as jnp
from jax.experimental import pallas as pl
from jax.experimental.pallas import tpu as pltpu


LANE = 512              # lane (last-dim) width, multiple of 128
ROW_BLOCK = 256         # sublane rows per tile, multiple of 8
_TILE_ELEMS = LANE * ROW_BLOCK          # 131072 elements per tile
_PALLAS_MIN_N = 8192    # below this, plain JAX beats kernel-launch overhead


def _mul_kernel(x_ref, y_ref, o_ref):
    # Full-width elementwise multiply on a lane-dense (ROW_BLOCK, LANE) tile.
    o_ref[...] = x_ref[...] * y_ref[...]


def _pallas_colprod(x, y, dtype):
    """x, y: 1-D arrays of identical (large) length n. Returns x * y via Pallas."""
    n = x.shape[0]
    # Pad so the (ROW_BLOCK, LANE) tiling divides evenly (at most one tile of waste).
    n_pad = ((n + _TILE_ELEMS - 1) // _TILE_ELEMS) * _TILE_ELEMS
    if n_pad != n:
        x = jnp.pad(x, (0, n_pad - n))
        y = jnp.pad(y, (0, n_pad - n))
    rows = n_pad // LANE
    x2 = x.reshape(rows, LANE)
    y2 = y.reshape(rows, LANE)

    out2 = pl.pallas_call(
        _mul_kernel,
        out_shape=jax.ShapeDtypeStruct((rows, LANE), dtype),
        grid=(rows // ROW_BLOCK,),
        in_specs=[
            pl.BlockSpec((ROW_BLOCK, LANE), lambda i: (i, 0)),
            pl.BlockSpec((ROW_BLOCK, LANE), lambda i: (i, 0)),
        ],
        out_specs=pl.BlockSpec((ROW_BLOCK, LANE), lambda i: (i, 0)),
        compiler_params=pltpu.CompilerParams(
            dimension_semantics=("parallel",),
        ),
    )(x2, y2)

    return out2.reshape(n_pad)[:n]


def net_forward(xy=None, params=None):
    """JAX/Pallas equivalent of Net.forward.

    If `xy` is given (shape (N, 2)), returns xy[:, 0] * xy[:, 1] (shape (N,)).
    If `xy` is None, returns x_param * y_param (shape (1,)).
    """
    if xy is None:
        # Trivial 1-element multiply of the module parameters: plain JAX.
        x_param, y_param = params
        return x_param * y_param

    n = xy.shape[0]
    # Split columns in the wrapper (cheap XLA slice) so the kernel never sees
    # a size-2 lane axis.
    x = xy[:, 0]
    y = xy[:, 1]

    if n < _PALLAS_MIN_N:
        # Launch overhead dominates for tiny N; XLA fuses this for free.
        return x * y

    return _pallas_colprod(x, y, xy.dtype)


if __name__ == "__main__":
    key = jax.random.PRNGKey(0)
    k_small, k_big = jax.random.split(key)

    # Deterministic parameters matching Net.__init__ (both zero, shape (1,)).
    params = (jnp.zeros((1,), jnp.float32), jnp.zeros((1,), jnp.float32))

    # 1) Small batch (fallback path), consistent with the module: (8, 2) pairs.
    xy_small = jax.random.normal(k_small, (8, 2), dtype=jnp.float32)
    out_small = net_forward(xy_small)
    jax.block_until_ready(out_small)
    ref_small = xy_small[:, 0] * xy_small[:, 1]
    assert out_small.shape == (8,)
    assert jnp.allclose(out_small, ref_small, atol=1e-6), "small-N mismatch"

    # 2) Larger batch to exercise the Pallas path (multi-tile grid + padding).
    n_big = 2 * _TILE_ELEMS + 100  # non-multiple of the tile size on purpose
    xy_big = jax.random.normal(k_big, (n_big, 2), dtype=jnp.float32)
    out_big = net_forward(xy_big)
    jax.block_until_ready(out_big)
    ref_big = xy_big[:, 0] * xy_big[:, 1]
    assert out_big.shape == (n_big,)
    assert jnp.allclose(out_big, ref_big, atol=1e-6), "large-N mismatch"

    # 3) xy=None path: product of the zero-initialized parameters.
    out_none = net_forward(None, params=params)
    jax.block_until_ready(out_none)
    assert out_none.shape == (1,)
    assert jnp.allclose(out_none, jnp.zeros((1,), jnp.float32))

    print("KERNEL_OK")
</pallas_src>

<mosaic_0001>
module attributes {stable_mosaic.version = 11 : i64} {
  func.func @_mul_kernel(%arg0: i32, %arg1: memref<256x512xf32, #tpu.memory_space<vmem>>, %arg2: memref<256x512xf32, #tpu.memory_space<vmem>>, %arg3: memref<256x512xf32, #tpu.memory_space<vmem>>) attributes {dimension_semantics = [#tpu.dimension_semantics<parallel>], iteration_bounds = array<i64: 3>, scalar_prefetch = 0 : i64, scratch_operands = 0 : i64, tpu.core_type = #tpu.core_type<tc>, window_params = [{transform_indices = @transform_0, window_bounds = array<i64: 256, 512>}, {transform_indices = @transform_1, window_bounds = array<i64: 256, 512>}, {transform_indices = @transform_2, window_bounds = array<i64: 256, 512>}]} {
    %c0 = arith.constant 0 : index
    %c0_0 = arith.constant 0 : index
    %0 = vector.load %arg1[%c0, %c0_0] : memref<256x512xf32, #tpu.memory_space<vmem>>, vector<256x512xf32>
    %c0_1 = arith.constant 0 : index
    %c0_2 = arith.constant 0 : index
    %1 = vector.load %arg2[%c0_1, %c0_2] : memref<256x512xf32, #tpu.memory_space<vmem>>, vector<256x512xf32>
    %2 = arith.mulf %0, %1 : vector<256x512xf32>
    %c0_3 = arith.constant 0 : index
    %c0_4 = arith.constant 0 : index
    %3 = vector.load %arg3[%c0_3, %c0_4] : memref<256x512xf32, #tpu.memory_space<vmem>>, vector<256x512xf32>
    tpu.vector_store %arg3[%c0_3, %c0_4], %2 {strides = array<i32>} : memref<256x512xf32, #tpu.memory_space<vmem>>, vector<256x512xf32>,
    return
  }
  func.func @transform_0(%arg0: i32) -> (i32, i32) {
    %c0_i32 = arith.constant 0 : i32
    %c0_i32_0 = arith.constant 0 : i32
    return %arg0, %c0_i32 : i32, i32
  }
  func.func @transform_1(%arg0: i32) -> (i32, i32) {
    %c0_i32 = arith.constant 0 : i32
    %c0_i32_0 = arith.constant 0 : i32
    return %arg0, %c0_i32 : i32, i32
  }
  func.func @transform_2(%arg0: i32) -> (i32, i32) {
    %c0_i32 = arith.constant 0 : i32
    %c0_i32_0 = arith.constant 0 : i32
    return %arg0, %c0_i32 : i32, i32
  }
}

</mosaic_0001>

<bundles_post_ra>
// kernel: tpu_custom_call.1
= control target key start
LH: loop header
LB: loop body
LE: loop exit
PB: predicated region body
PF: predicated region fallthrough
CT: control target
= control target key end

     0   :  { %7 = vsyncpa [#allocation3], 0  ;;  %s1678_s0 = inlined_call_operand.hbm [shape: f32[768,512], index: 0, kind: input, shape index: {}]   ;;  %s1679_s1 = inlined_call_operand.hbm [shape: f32[768,512], index: 1, kind: input, shape index: {}]   ;;  %s1680_s2 = inlined_call_operand.hbm [shape: f32[768,512], index: 2, kind: output, shape index: {}]  }
   0x1   :  { %9 = vsyncpa [#allocation3 + $0x1], 0 }
   0x2   :  { %10 = vsyncpa [#allocation6], 0 }
   0x3   :  { %12 = vsyncpa [#allocation6 + $0x1], 0 }
   0x4   :  { %13 = vsyncpa [#allocation4], 0 }
   0x5   :  { %15 = vsyncpa [#allocation4 + $0x1], 0  ;;  %s1066_s9 = smov 0   ;;  %s1068_s10 = smov 0  }
   0x6   :  { %s1070_s11 = smov 0   ;;  %s1072_s12 = smov 0  }
   0x7 LB: > { %s1087_s13 = sadd.s32 4294967295, %s1042_s12   ;;  %s830_s14 = sadd.s32 4294967294, %s1042_s12   ;;  %s1042_s12 = sphi %s1072_s12, %s1695_s12   ;;  %s1038_s11 = sphi %s1070_s11, %s1694_s11   ;;  %s1034_s10 = sphi %s1068_s10, %s1693_s10   ;;  %s1030_s9 = sphi %s1066_s9, %s1692_s9  }
   0x8   : > { %s1091_s15 = sadd.s32 1, %s1042_s12   ;;  %s28_s16 = sadd.s32 1, %s1038_s11 }
   0x9   : > { %s25_s17 = ssub.s32 %s1042_s12, %s1091_s15  ;;  %p35_p0 = scmp.ne.s32.totalorder %s1038_s11, %s1034_s10 }
   0xa   : > { %p26_p1 = scmp.eq.s32.totalorder %s25_s17, 0  ;;  %p36_p2 = scmp.eq.s32.totalorder %s1042_s12, 0 }
   0xb   : > { %p41_p3 = scmp.ne.s32.totalorder %s1034_s10, %s1030_s9  ;;  %p42_p4 = scmp.eq.s32.totalorder %s1087_s13, 0 }
   0xc   : > { %s1103_s18 = scalar_select %p26_p1, %s1038_s11, %s28_s16  }
   0xd   : > { %p1105_p5 = por %p36_p2, %p35_p0  ;;  %p1109_p6 = por %p42_p4, %p41_p3 }
   0xe   : > { %p91_p7 = scmp.eq.s32.totalorder %s1087_s13, 2  ;;  %p97_p8 = scmp.eq.s32.totalorder %s830_s14, 2 }
   0xf   : > { %s1684_s20 = scalar_select %p1109_p6, 1, 0 }
  0x10   : > { %p874_p9 = scmp.lt.s32.totalorder %s1042_s12, 3  ;;  %p1115_p10 = por %p91_p7, %p35_p0 }
  0x11   : > { %p1119_p11 = por %p97_p8, %p41_p3  ;;  %s1124_s23 = sand.u32 1, %s1038_s11  }
  0x12   : > { %s1685_s21 = scalar_select %p1115_p10, 1, 0 }
  0x13   : > { %s1686_s22 = scalar_select %p1119_p11, 1, 0 }
  0x14   : > { %s852_s24 = sshll.u32 %s1042_s12, 14  ;;  %s833_s25 = sshll.u32 %s1124_s23, 10 }
  0x15   : > { %s1133_s28 = scalar_lea.hbm %s1678_s0, %s852_s24  ;;  %s121_s29 = scalar_lea.vmem [#allocation2], %s833_s25 }
  0x16   : > { %s129_s30 = sshll.u32 %s121_s29, 4  ;;  %p1139_p12 = pnand %p874_p9, %p1105_p5  ;;  %s1143_s30 = int_to_ptr.vmem [resolvable:$true] %s129_s30 }
  0x17   : > { %s118_s4 = scalar_lea.sflag [#allocation3], %s1124_s23  ;;  %s912_s5 = scalar_lea.hbm %s1133_s28, 16384 }
  0x18   : > { %p913_p13 = scmp.ne.s32.totalorder %s1133_s28, %s912_s5  ;;  %p914_p0 = pneg %p1139_p12 }
  0x19   : > { %s917_s8 = scalar_lea.hbm %s1678_s0, 49152  ;;  %p918_p3 = scmp.lt.u32.totalorder %s1133_s28, %s1678_s0 }
  0x1a   : > { %p915_p1 = pnand %p914_p0, %p913_p13  ;;  %p919_p4 = scmp.lt.u32.totalorder %s917_s8, %s912_s5 }
  0x1b   : > { %p921_p7 = scmp.lt.u32.totalorder %s912_s5, %s1133_s28 }
  0x1c   : > { %p916_p2 = pneg %p915_p1  ;;  %p920_p5 = por %p919_p4, %p918_p3 }
  0x1e   : > { %p922_p8 = por %p921_p7, %p920_p5 }
  0x20   : > { %p923_p9 = pnand %p922_p8, %p916_p2 }
  0x22   : > { %926 = shalt.err (!%p923_p9)
}
  0x23   : > { %s927_s17 = scalar_lea.vmem %s1143_s30, 16384  ;;  %s1044_s19 = smov [#allocation2]  }
  0x24   : > { %p928_p13 = scmp.ne.s32.totalorder %s1143_s30, %s927_s17  ;;  %s932_s26 = sshll.u32 %s1044_s19, 4  ;;  %s933_s26 = int_to_ptr.vmem [resolvable:$false] %s932_s26 }
  0x25   : > { %s934_s27 = scalar_lea.vmem %s933_s26, 32768  ;;  %p935_p10 = scmp.lt.s32.totalorder %s1143_s30, %s933_s26 }
  0x26   : > { %p930_p1 = pnand %p928_p13, %p914_p0  ;;  %p936_p3 = scmp.lt.s32.totalorder %s934_s27, %s927_s17 }
  0x28   : > { %p931_p11 = pneg %p930_p1  ;;  %p937_p4 = por %p936_p3, %p935_p10 }
  0x2a   : > { %p938_p5 = pnand %p937_p4, %p931_p11 }
  0x2c   : > { %941 = shalt.err (!%p938_p5)
}
  0x2d   : > { %s1045_s29 = smov 512   ;;  %s1046_s5 = smov 32  }
  0x2e   : > { %866 = dma.hbm_to_vmem [thread:$0]  (!%p1139_p12), %s1133_s28, 16384, %s1143_s30, %s118_s4, %s1045_s29, %s1045_s29, %s1046_s5  }
  0x2f   : > { %p841_p10 = scmp.ge.s32.totalorder %s1042_s12, 1  ;;  %p159_p11 = scmp.lt.s32.totalorder %s1042_s12, 4 }
  0x30   : > { %s1187_s14 = scalar_lea.hbm %s1679_s1, %s852_s24  ;;  %s143_s16 = scalar_lea.vmem [#allocation5], %s833_s25 }
  0x31   : > { %p1178_p2 = pnand %p841_p10, %p159_p11  ;;  %s151_s17 = sshll.u32 %s143_s16, 4  ;;  %s1191_s17 = int_to_ptr.vmem [resolvable:$true] %s151_s17 }
  0x32   : > { %s140_s28 = scalar_lea.sflag [#allocation6], %s1124_s23  ;;  %s942_s30 = scalar_lea.hbm %s1187_s14, 16384 }
  0x33   : > { %p943_p7 = scmp.ne.s32.totalorder %s1187_s14, %s942_s30  ;;  %s947_s24 = scalar_lea.hbm %s1679_s1, 49152 }
  0x34   : > { %p948_p13 = scmp.lt.u32.totalorder %s1187_s14, %s1679_s1  ;;  %p949_p1 = scmp.lt.u32.totalorder %s947_s24, %s942_s30 }
  0x35   : > { %p945_p8 = pnand %p943_p7, %p914_p0  ;;  %p951_p4 = scmp.lt.u32.totalorder %s942_s30, %s1187_s14 }
  0x36   : > { %p950_p3 = por %p949_p1, %p948_p13 }
  0x37   : > { %p946_p9 = pneg %p945_p8 }
  0x38   : > { %p952_p5 = por %p951_p4, %p950_p3 }
  0x3a   : > { %p953_p10 = pnand %p952_p5, %p946_p9 }
  0x3c   : > { %956 = shalt.err (!%p953_p10)
}
  0x3d   : > { %s957_s25 = scalar_lea.vmem %s1191_s17, 16384  ;;  %s1047_s7 = smov [#allocation5]  }
  0x3e   : > { %p958_p11 = scmp.ne.s32.totalorder %s1191_s17, %s957_s25  ;;  %s962_s8 = sshll.u32 %s1047_s7, 4  ;;  %s963_s8 = int_to_ptr.vmem [resolvable:$false] %s962_s8 }
  0x3f   : > { %s964_s16 = scalar_lea.vmem %s963_s8, 32768  ;;  %p965_p6 = scmp.lt.s32.totalorder %s1191_s17, %s963_s8 }
  0x40   : > { %p960_p7 = pnand %p958_p11, %p914_p0  ;;  %p966_p13 = scmp.lt.s32.totalorder %s964_s16, %s957_s25 }
  0x42   : > { %p961_p8 = pneg %p960_p7  ;;  %p967_p1 = por %p966_p13, %p965_p6 }
  0x44   : > { %p968_p3 = pnand %p967_p1, %p961_p8 }
  0x46   : > { %971 = shalt.err (!%p968_p3)
}
  0x47   : > { %869 = dma.hbm_to_vmem [thread:$0]  (!%p1139_p12), %s1187_s14, 16384, %s1191_s17, %s140_s28, %s1045_s29, %s1045_s29, %s1046_s5  }
  0x48   : > { %163 = sbr.rel (%p1178_p2) target bundleno = 199 (0xc7), region = 28  ;;  %s1225_s30 = sand.u32 (!%p1178_p2), 1, %s1034_s10  }
  0x49   : > { %s842_s4 = sshll.u32 (!%p1178_p2), %s1225_s30, 10  ;;  %s166_s19 = scalar_lea.sflag (!%p1178_p2), [#allocation3], %s1225_s30 }
  0x4a   : > { %s1229_s3 = scalar_lea.vmem (!%p1178_p2), [#allocation2], %s842_s4  ;;  %p1689_p6 = scmp.ne.s32.totalorder (!%p1178_p2), %s1684_s20, 0 }
  0x4f   : > { %1017 = dma.done.wait (%p1689_p6), %s166_s19, 16384  }
  0x50   : > { %1019 = vsyncadd (%p1689_p6), %s166_s19, 4294950912  ;;  %s175_s23 = scalar_lea.sflag [#allocation6], %s1225_s30  ;;  %s1236_s29 = scalar_lea.vmem [#allocation5], %s842_s4 }
  0x51   : > { %1021 = dma.done.wait (%p1689_p6), %s175_s23, 16384  }
  0x52   : > { %1023 = vsyncadd (%p1689_p6), %s175_s23, 4294950912  ;;  %v207_v0 = vld [vmem:[%s1229_s3] sm:$0xff]  ;;  %v208_v2 = vld [vmem:[%s1229_s3 + $0x8] sm:$0xff]  ;;  %s1251_s20 = scalar_lea.vmem [#allocation7], %s842_s4  ;;  %s856_s5 = sshll.u32 %s1087_s13, 14 }
  0x53   : > { %v335_v1 = vld [vmem:[%s1236_s29] sm:$0xff]  ;;  %v336_v4 = vld [vmem:[%s1236_s29 + $0x8] sm:$0xff]  ;;  %v209_v5 = vld [vmem:[%s1229_s3 + $0x10] sm:$0xff]  ;;  %s734_s6 = sshll.u32 %s1251_s20, 4  ;;  %s1629_s17 = scalar_lea.hbm %s1680_s2, %s856_s5  ;;  %s1631_s6 = int_to_ptr.vmem [resolvable:$true] %s734_s6 }
  0x54   : > { %v463_v3 = vmul.f32 %v335_v1, %v207_v0  ;;  %v337_v6 = vld [vmem:[%s1236_s29 + $0x10] sm:$0xff]  ;;  %v464_v7 = vmul.f32 %v336_v4, %v208_v2  ;;  %v210_v9 = vld [vmem:[%s1229_s3 + $0x18] sm:$0xff]  ;;  %v211_v11 = vld [vmem:[%s1229_s3 + $0x20] sm:$0xff]  ;;  %s720_s28 = scalar_lea.sflag [#allocation4], %s1225_s30  ;;  %s972_s24 = scalar_lea.vmem %s1631_s6, 16384 }
  0x55   : > { %v465_v8 = vmul.f32 %v337_v6, %v209_v5  ;;  %v338_v10 = vld [vmem:[%s1236_s29 + $0x18] sm:$0xff]  ;;  %v339_v13 = vld [vmem:[%s1236_s29 + $0x20] sm:$0xff]  ;;  %v212_v14 = vld [vmem:[%s1229_s3 + $0x28] sm:$0xff]  ;;  %p973_p12 = scmp.ne.s32.totalorder %s1631_s6, %s972_s24  ;;  %p1690_p0 = scmp.ne.s32.totalorder %s1685_s21, 0 }
  0x56   : > { %591 = vst [vmem:[%s1251_s20] sm:$0xff] %v463_v3  ;;  %v466_v12 = vmul.f32 %v338_v10, %v210_v9  ;;  %v340_v15 = vld [vmem:[%s1236_s29 + $0x28] sm:$0xff]  ;;  %592 = vst [vmem:[%s1251_s20 + $0x8] sm:$0xff] %v464_v7  ;;  %v467_v16 = vmul.f32 %v339_v13, %v211_v11  ;;  %v213_v18 = vld [vmem:[%s1229_s3 + $0x30] sm:$0xff]  ;;  %s1048_s26 = smov [#allocation7]  }
  0x57   : > { %593 = vst [vmem:[%s1251_s20 + $0x10] sm:$0xff] %v465_v8  ;;  %v468_v17 = vmul.f32 %v340_v15, %v212_v14  ;;  %v341_v19 = vld [vmem:[%s1236_s29 + $0x30] sm:$0xff]  ;;  %v214_v20 = vld [vmem:[%s1229_s3 + $0x38] sm:$0xff]  ;;  %v215_v23 = vld [vmem:[%s1229_s3 + $0x40] sm:$0xff]  ;;  %p974_p2 = pnand %p973_p12, %p1690_p0  ;;  %s976_s27 = sshll.u32 %s1048_s26, 4  ;;  %s977_s27 = int_to_ptr.vmem [resolvable:$false] %s976_s27 }
  0x58   : > { %594 = vst [vmem:[%s1251_s20 + $0x18] sm:$0xff] %v466_v12  ;;  %v469_v21 = vmul.f32 %v341_v19, %v213_v18  ;;  %v342_v22 = vld [vmem:[%s1236_s29 + $0x38] sm:$0xff]  ;;  %v343_v24 = vld [vmem:[%s1236_s29 + $0x40] sm:$0xff]  ;;  %595 = vst [vmem:[%s1251_s20 + $0x20] sm:$0xff] %v467_v16  ;;  %s978_s25 = scalar_lea.vmem %s977_s27, 32768  ;;  %p979_p4 = scmp.lt.s32.totalorder %s1631_s6, %s977_s27 }
  0x59   : > { %596 = vst [vmem:[%s1251_s20 + $0x28] sm:$0xff] %v468_v17  ;;  %v470_v25 = vmul.f32 %v342_v22, %v214_v20  ;;  %v471_v26 = vmul.f32 %v343_v24, %v215_v23  ;;  %v216_v27 = vld [vmem:[%s1229_s3 + $0x48] sm:$0xff]  ;;  %v217_v29 = vld [vmem:[%s1229_s3 + $0x50] sm:$0xff]  ;;  %v218_v32 = vld [vmem:[%s1229_s3 + $0x58] sm:$0xff]  ;;  %p975_p9 = pneg %p974_p2  ;;  %p980_p5 = scmp.lt.s32.totalorder %s978_s25, %s972_s24 }
  0x5a   : > { %v344_v28 = vld [vmem:[%s1236_s29 + $0x48] sm:$0xff]  ;;  %597 = vst [vmem:[%s1251_s20 + $0x30] sm:$0xff] %v469_v21  ;;  %v345_v31 = vld [vmem:[%s1236_s29 + $0x50] sm:$0xff]  ;;  %v346_v33 = vld [vmem:[%s1236_s29 + $0x58] sm:$0xff] }
  0x5b   : > { %v472_v30 = vmul.f32 %v344_v28, %v216_v27  ;;  %598 = vst [vmem:[%s1251_s20 + $0x38] sm:$0xff] %v470_v25  ;;  %599 = vst [vmem:[%s1251_s20 + $0x40] sm:$0xff] %v471_v26  ;;  %v473_v34 = vmul.f32 %v345_v31, %v217_v29  ;;  %v474_v35 = vmul.f32 %v346_v33, %v218_v32  ;;  %v219_v36 = vld [vmem:[%s1229_s3 + $0x60] sm:$0xff]  ;;  %v220_v38 = vld [vmem:[%s1229_s3 + $0x68] sm:$0xff]  ;;  %p981_p10 = por %p980_p5, %p979_p4 }
  0x5c   : > { %v347_v37 = vld [vmem:[%s1236_s29 + $0x60] sm:$0xff]  ;;  %v348_v40 = vld [vmem:[%s1236_s29 + $0x68] sm:$0xff]  ;;  %v221_v41 = vld [vmem:[%s1229_s3 + $0x70] sm:$0xff] }
  0x5d   : > { %600 = vst [vmem:[%s1251_s20 + $0x48] sm:$0xff] %v472_v30  ;;  %v475_v39 = vmul.f32 %v347_v37, %v219_v36  ;;  %v349_v42 = vld [vmem:[%s1236_s29 + $0x70] sm:$0xff]  ;;  %601 = vst [vmem:[%s1251_s20 + $0x50] sm:$0xff] %v473_v34  ;;  %v476_v43 = vmul.f32 %v348_v40, %v220_v38  ;;  %v222_v45 = vld [vmem:[%s1229_s3 + $0x78] sm:$0xff]  ;;  %p982_p11 = pnand %p981_p10, %p975_p9 }
  0x5e   : > { %602 = vst [vmem:[%s1251_s20 + $0x58] sm:$0xff] %v474_v35  ;;  %v477_v44 = vmul.f32 %v349_v42, %v221_v41  ;;  %v350_v46 = vld [vmem:[%s1236_s29 + $0x78] sm:$0xff]  ;;  %v223_v47 = vld [vmem:[%s1229_s3 + $0x80] sm:$0xff]  ;;  %v224_v50 = vld [vmem:[%s1229_s3 + $0x88] sm:$0xff] }
  0x5f   : > { %603 = vst [vmem:[%s1251_s20 + $0x60] sm:$0xff] %v475_v39  ;;  %v478_v48 = vmul.f32 %v350_v46, %v222_v45  ;;  %v351_v49 = vld [vmem:[%s1236_s29 + $0x80] sm:$0xff]  ;;  %v352_v51 = vld [vmem:[%s1236_s29 + $0x88] sm:$0xff]  ;;  %604 = vst [vmem:[%s1251_s20 + $0x68] sm:$0xff] %v476_v43 }
  0x60   : > { %605 = vst [vmem:[%s1251_s20 + $0x70] sm:$0xff] %v477_v44  ;;  %v479_v52 = vmul.f32 %v351_v49, %v223_v47  ;;  %v480_v53 = vmul.f32 %v352_v51, %v224_v50  ;;  %v225_v54 = vld [vmem:[%s1229_s3 + $0x90] sm:$0xff]  ;;  %v226_v56 = vld [vmem:[%s1229_s3 + $0x98] sm:$0xff]  ;;  %v227_v59 = vld [vmem:[%s1229_s3 + $0xa0] sm:$0xff] }
  0x61   : > { %v353_v55 = vld [vmem:[%s1236_s29 + $0x90] sm:$0xff]  ;;  %606 = vst [vmem:[%s1251_s20 + $0x78] sm:$0xff] %v478_v48  ;;  %v354_v58 = vld [vmem:[%s1236_s29 + $0x98] sm:$0xff]  ;;  %v355_v60 = vld [vmem:[%s1236_s29 + $0xa0] sm:$0xff] }
  0x62   : > { %v481_v57 = vmul.f32 %v353_v55, %v225_v54  ;;  %607 = vst [vmem:[%s1251_s20 + $0x80] sm:$0xff] %v479_v52  ;;  %608 = vst [vmem:[%s1251_s20 + $0x88] sm:$0xff] %v480_v53  ;;  %v482_v61 = vmul.f32 %v354_v58, %v226_v56  ;;  %v483_v62 = vmul.f32 %v355_v60, %v227_v59  ;;  %v228_v63 = vld [vmem:[%s1229_s3 + $0xa8] sm:$0xff]  ;;  %v229_v1 = vld [vmem:[%s1229_s3 + $0xb0] sm:$0xff] }
  0x63   : > { %v356_v0 = vld [vmem:[%s1236_s29 + $0xa8] sm:$0xff]  ;;  %v357_v3 = vld [vmem:[%s1236_s29 + $0xb0] sm:$0xff]  ;;  %v230_v4 = vld [vmem:[%s1229_s3 + $0xb8] sm:$0xff] }
  0x64   : > { %609 = vst [vmem:[%s1251_s20 + $0x90] sm:$0xff] %v481_v57  ;;  %v484_v2 = vmul.f32 %v356_v0, %v228_v63  ;;  %v358_v5 = vld [vmem:[%s1236_s29 + $0xb8] sm:$0xff]  ;;  %610 = vst [vmem:[%s1251_s20 + $0x98] sm:$0xff] %v482_v61  ;;  %v485_v6 = vmul.f32 %v357_v3, %v229_v1  ;;  %v231_v8 = vld [vmem:[%s1229_s3 + $0xc0] sm:$0xff] }
  0x65   : > { %611 = vst [vmem:[%s1251_s20 + $0xa0] sm:$0xff] %v483_v62  ;;  %v486_v7 = vmul.f32 %v358_v5, %v230_v4  ;;  %v359_v9 = vld [vmem:[%s1236_s29 + $0xc0] sm:$0xff]  ;;  %v232_v10 = vld [vmem:[%s1229_s3 + $0xc8] sm:$0xff]  ;;  %v233_v13 = vld [vmem:[%s1229_s3 + $0xd0] sm:$0xff] }
  0x66   : > { %612 = vst [vmem:[%s1251_s20 + $0xa8] sm:$0xff] %v484_v2  ;;  %v487_v11 = vmul.f32 %v359_v9, %v231_v8  ;;  %v360_v12 = vld [vmem:[%s1236_s29 + $0xc8] sm:$0xff]  ;;  %v361_v14 = vld [vmem:[%s1236_s29 + $0xd0] sm:$0xff]  ;;  %613 = vst [vmem:[%s1251_s20 + $0xb0] sm:$0xff] %v485_v6 }
  0x67   : > { %614 = vst [vmem:[%s1251_s20 + $0xb8] sm:$0xff] %v486_v7  ;;  %v488_v15 = vmul.f32 %v360_v12, %v232_v10  ;;  %v489_v16 = vmul.f32 %v361_v14, %v233_v13  ;;  %v234_v17 = vld [vmem:[%s1229_s3 + $0xd8] sm:$0xff]  ;;  %v235_v19 = vld [vmem:[%s1229_s3 + $0xe0] sm:$0xff]  ;;  %v236_v22 = vld [vmem:[%s1229_s3 + $0xe8] sm:$0xff] }
  0x68   : > { %v362_v18 = vld [vmem:[%s1236_s29 + $0xd8] sm:$0xff]  ;;  %615 = vst [vmem:[%s1251_s20 + $0xc0] sm:$0xff] %v487_v11  ;;  %v363_v21 = vld [vmem:[%s1236_s29 + $0xe0] sm:$0xff]  ;;  %v364_v23 = vld [vmem:[%s1236_s29 + $0xe8] sm:$0xff] }
  0x69   : > { %v490_v20 = vmul.f32 %v362_v18, %v234_v17  ;;  %616 = vst [vmem:[%s1251_s20 + $0xc8] sm:$0xff] %v488_v15  ;;  %617 = vst [vmem:[%s1251_s20 + $0xd0] sm:$0xff] %v489_v16  ;;  %v491_v24 = vmul.f32 %v363_v21, %v235_v19  ;;  %v492_v25 = vmul.f32 %v364_v23, %v236_v22  ;;  %v237_v26 = vld [vmem:[%s1229_s3 + $0xf0] sm:$0xff]  ;;  %v238_v28 = vld [vmem:[%s1229_s3 + $0xf8] sm:$0xff] }
  0x6a   : > { %v365_v27 = vld [vmem:[%s1236_s29 + $0xf0] sm:$0xff]  ;;  %v366_v30 = vld [vmem:[%s1236_s29 + $0xf8] sm:$0xff]  ;;  %v239_v31 = vld [vmem:[%s1229_s3 + $0x100] sm:$0xff] }
  0x6b   : > { %618 = vst [vmem:[%s1251_s20 + $0xd8] sm:$0xff] %v490_v20  ;;  %v493_v29 = vmul.f32 %v365_v27, %v237_v26  ;;  %v367_v32 = vld [vmem:[%s1236_s29 + $0x100] sm:$0xff]  ;;  %619 = vst [vmem:[%s1251_s20 + $0xe0] sm:$0xff] %v491_v24  ;;  %v494_v33 = vmul.f32 %v366_v30, %v238_v28  ;;  %v240_v35 = vld [vmem:[%s1229_s3 + $0x108] sm:$0xff] }
  0x6c   : > { %620 = vst [vmem:[%s1251_s20 + $0xe8] sm:$0xff] %v492_v25  ;;  %v495_v34 = vmul.f32 %v367_v32, %v239_v31  ;;  %v368_v36 = vld [vmem:[%s1236_s29 + $0x108] sm:$0xff]  ;;  %v241_v37 = vld [vmem:[%s1229_s3 + $0x110] sm:$0xff]  ;;  %v242_v40 = vld [vmem:[%s1229_s3 + $0x118] sm:$0xff] }
  0x6d   : > { %621 = vst [vmem:[%s1251_s20 + $0xf0] sm:$0xff] %v493_v29  ;;  %v496_v38 = vmul.f32 %v368_v36, %v240_v35  ;;  %v369_v39 = vld [vmem:[%s1236_s29 + $0x110] sm:$0xff]  ;;  %v370_v41 = vld [vmem:[%s1236_s29 + $0x118] sm:$0xff]  ;;  %622 = vst [vmem:[%s1251_s20 + $0xf8] sm:$0xff] %v494_v33 }
  0x6e   : > { %623 = vst [vmem:[%s1251_s20 + $0x100] sm:$0xff] %v495_v34  ;;  %v497_v42 = vmul.f32 %v369_v39, %v241_v37  ;;  %v498_v43 = vmul.f32 %v370_v41, %v242_v40  ;;  %v243_v44 = vld [vmem:[%s1229_s3 + $0x120] sm:$0xff]  ;;  %v244_v46 = vld [vmem:[%s1229_s3 + $0x128] sm:$0xff]  ;;  %v245_v49 = vld [vmem:[%s1229_s3 + $0x130] sm:$0xff] }
  0x6f   : > { %v371_v45 = vld [vmem:[%s1236_s29 + $0x120] sm:$0xff]  ;;  %624 = vst [vmem:[%s1251_s20 + $0x108] sm:$0xff] %v496_v38  ;;  %v372_v48 = vld [vmem:[%s1236_s29 + $0x128] sm:$0xff]  ;;  %v373_v50 = vld [vmem:[%s1236_s29 + $0x130] sm:$0xff] }
  0x70   : > { %v499_v47 = vmul.f32 %v371_v45, %v243_v44  ;;  %625 = vst [vmem:[%s1251_s20 + $0x110] sm:$0xff] %v497_v42  ;;  %626 = vst [vmem:[%s1251_s20 + $0x118] sm:$0xff] %v498_v43  ;;  %v500_v51 = vmul.f32 %v372_v48, %v244_v46  ;;  %v501_v52 = vmul.f32 %v373_v50, %v245_v49  ;;  %v246_v53 = vld [vmem:[%s1229_s3 + $0x138] sm:$0xff]  ;;  %v247_v55 = vld [vmem:[%s1229_s3 + $0x140] sm:$0xff] }
  0x71   : > { %v374_v54 = vld [vmem:[%s1236_s29 + $0x138] sm:$0xff]  ;;  %v375_v57 = vld [vmem:[%s1236_s29 + $0x140] sm:$0xff]  ;;  %v248_v58 = vld [vmem:[%s1229_s3 + $0x148] sm:$0xff] }
  0x72   : > { %627 = vst [vmem:[%s1251_s20 + $0x120] sm:$0xff] %v499_v47  ;;  %v502_v56 = vmul.f32 %v374_v54, %v246_v53  ;;  %v376_v59 = vld [vmem:[%s1236_s29 + $0x148] sm:$0xff]  ;;  %628 = vst [vmem:[%s1251_s20 + $0x128] sm:$0xff] %v500_v51  ;;  %v503_v60 = vmul.f32 %v375_v57, %v247_v55  ;;  %v249_v62 = vld [vmem:[%s1229_s3 + $0x150] sm:$0xff] }
  0x73   : > { %629 = vst [vmem:[%s1251_s20 + $0x130] sm:$0xff] %v501_v52  ;;  %v504_v61 = vmul.f32 %v376_v59, %v248_v58  ;;  %v377_v63 = vld [vmem:[%s1236_s29 + $0x150] sm:$0xff]  ;;  %v250_v0 = vld [vmem:[%s1229_s3 + $0x158] sm:$0xff]  ;;  %v251_v3 = vld [vmem:[%s1229_s3 + $0x160] sm:$0xff] }
  0x74   : > { %630 = vst [vmem:[%s1251_s20 + $0x138] sm:$0xff] %v502_v56  ;;  %v505_v1 = vmul.f32 %v377_v63, %v249_v62  ;;  %v378_v2 = vld [vmem:[%s1236_s29 + $0x158] sm:$0xff]  ;;  %v379_v4 = vld [vmem:[%s1236_s29 + $0x160] sm:$0xff]  ;;  %631 = vst [vmem:[%s1251_s20 + $0x140] sm:$0xff] %v503_v60 }
  0x75   : > { %632 = vst [vmem:[%s1251_s20 + $0x148] sm:$0xff] %v504_v61  ;;  %v506_v5 = vmul.f32 %v378_v2, %v250_v0  ;;  %v507_v6 = vmul.f32 %v379_v4, %v251_v3  ;;  %v252_v7 = vld [vmem:[%s1229_s3 + $0x168] sm:$0xff]  ;;  %v253_v9 = vld [vmem:[%s1229_s3 + $0x170] sm:$0xff]  ;;  %v254_v12 = vld [vmem:[%s1229_s3 + $0x178] sm:$0xff] }
  0x76   : > { %v380_v8 = vld [vmem:[%s1236_s29 + $0x168] sm:$0xff]  ;;  %633 = vst [vmem:[%s1251_s20 + $0x150] sm:$0xff] %v505_v1  ;;  %v381_v11 = vld [vmem:[%s1236_s29 + $0x170] sm:$0xff]  ;;  %v382_v13 = vld [vmem:[%s1236_s29 + $0x178] sm:$0xff] }
  0x77   : > { %v508_v10 = vmul.f32 %v380_v8, %v252_v7  ;;  %634 = vst [vmem:[%s1251_s20 + $0x158] sm:$0xff] %v506_v5  ;;  %635 = vst [vmem:[%s1251_s20 + $0x160] sm:$0xff] %v507_v6  ;;  %v509_v14 = vmul.f32 %v381_v11, %v253_v9  ;;  %v510_v15 = vmul.f32 %v382_v13, %v254_v12  ;;  %v255_v16 = vld [vmem:[%s1229_s3 + $0x180] sm:$0xff]  ;;  %v256_v18 = vld [vmem:[%s1229_s3 + $0x188] sm:$0xff] }
  0x78   : > { %v383_v17 = vld [vmem:[%s1236_s29 + $0x180] sm:$0xff]  ;;  %v384_v20 = vld [vmem:[%s1236_s29 + $0x188] sm:$0xff]  ;;  %v257_v21 = vld [vmem:[%s1229_s3 + $0x190] sm:$0xff] }
  0x79   : > { %636 = vst [vmem:[%s1251_s20 + $0x168] sm:$0xff] %v508_v10  ;;  %v511_v19 = vmul.f32 %v383_v17, %v255_v16  ;;  %v385_v22 = vld [vmem:[%s1236_s29 + $0x190] sm:$0xff]  ;;  %637 = vst [vmem:[%s1251_s20 + $0x170] sm:$0xff] %v509_v14  ;;  %v512_v23 = vmul.f32 %v384_v20, %v256_v18  ;;  %v258_v25 = vld [vmem:[%s1229_s3 + $0x198] sm:$0xff] }
  0x7a   : > { %638 = vst [vmem:[%s1251_s20 + $0x178] sm:$0xff] %v510_v15  ;;  %v513_v24 = vmul.f32 %v385_v22, %v257_v21  ;;  %v386_v26 = vld [vmem:[%s1236_s29 + $0x198] sm:$0xff]  ;;  %v259_v27 = vld [vmem:[%s1229_s3 + $0x1a0] sm:$0xff]  ;;  %v260_v30 = vld [vmem:[%s1229_s3 + $0x1a8] sm:$0xff] }
  0x7b   : > { %639 = vst [vmem:[%s1251_s20 + $0x180] sm:$0xff] %v511_v19  ;;  %v514_v28 = vmul.f32 %v386_v26, %v258_v25  ;;  %v387_v29 = vld [vmem:[%s1236_s29 + $0x1a0] sm:$0xff]  ;;  %v388_v31 = vld [vmem:[%s1236_s29 + $0x1a8] sm:$0xff]  ;;  %640 = vst [vmem:[%s1251_s20 + $0x188] sm:$0xff] %v512_v23 }
  0x7c   : > { %641 = vst [vmem:[%s1251_s20 + $0x190] sm:$0xff] %v513_v24  ;;  %v515_v32 = vmul.f32 %v387_v29, %v259_v27  ;;  %v516_v33 = vmul.f32 %v388_v31, %v260_v30  ;;  %v261_v34 = vld [vmem:[%s1229_s3 + $0x1b0] sm:$0xff]  ;;  %v262_v36 = vld [vmem:[%s1229_s3 + $0x1b8] sm:$0xff]  ;;  %v263_v39 = vld [vmem:[%s1229_s3 + $0x1c0] sm:$0xff] }
  0x7d   : > { %v389_v35 = vld [vmem:[%s1236_s29 + $0x1b0] sm:$0xff]  ;;  %642 = vst [vmem:[%s1251_s20 + $0x198] sm:$0xff] %v514_v28  ;;  %v390_v38 = vld [vmem:[%s1236_s29 + $0x1b8] sm:$0xff]  ;;  %v391_v40 = vld [vmem:[%s1236_s29 + $0x1c0] sm:$0xff] }
  0x7e   : > { %v517_v37 = vmul.f32 %v389_v35, %v261_v34  ;;  %643 = vst [vmem:[%s1251_s20 + $0x1a0] sm:$0xff] %v515_v32  ;;  %644 = vst [vmem:[%s1251_s20 + $0x1a8] sm:$0xff] %v516_v33  ;;  %v518_v41 = vmul.f32 %v390_v38, %v262_v36  ;;  %v519_v42 = vmul.f32 %v391_v40, %v263_v39  ;;  %v264_v43 = vld [vmem:[%s1229_s3 + $0x1c8] sm:$0xff]  ;;  %v265_v45 = vld [vmem:[%s1229_s3 + $0x1d0] sm:$0xff] }
  0x7f   : > { %v392_v44 = vld [vmem:[%s1236_s29 + $0x1c8] sm:$0xff]  ;;  %v393_v47 = vld [vmem:[%s1236_s29 + $0x1d0] sm:$0xff]  ;;  %v266_v48 = vld [vmem:[%s1229_s3 + $0x1d8] sm:$0xff] }
  0x80   : > { %645 = vst [vmem:[%s1251_s20 + $0x1b0] sm:$0xff] %v517_v37  ;;  %v520_v46 = vmul.f32 %v392_v44, %v264_v43  ;;  %v394_v49 = vld [vmem:[%s1236_s29 + $0x1d8] sm:$0xff]  ;;  %646 = vst [vmem:[%s1251_s20 + $0x1b8] sm:$0xff] %v518_v41  ;;  %v521_v50 = vmul.f32 %v393_v47, %v265_v45  ;;  %v267_v52 = vld [vmem:[%s1229_s3 + $0x1e0] sm:$0xff] }
  0x81   : > { %647 = vst [vmem:[%s1251_s20 + $0x1c0] sm:$0xff] %v519_v42  ;;  %v522_v51 = vmul.f32 %v394_v49, %v266_v48  ;;  %v395_v53 = vld [vmem:[%s1236_s29 + $0x1e0] sm:$0xff]  ;;  %v268_v54 = vld [vmem:[%s1229_s3 + $0x1e8] sm:$0xff]  ;;  %v269_v57 = vld [vmem:[%s1229_s3 + $0x1f0] sm:$0xff] }
  0x82   : > { %648 = vst [vmem:[%s1251_s20 + $0x1c8] sm:$0xff] %v520_v46  ;;  %v523_v55 = vmul.f32 %v395_v53, %v267_v52  ;;  %v396_v56 = vld [vmem:[%s1236_s29 + $0x1e8] sm:$0xff]  ;;  %v397_v58 = vld [vmem:[%s1236_s29 + $0x1f0] sm:$0xff]  ;;  %649 = vst [vmem:[%s1251_s20 + $0x1d0] sm:$0xff] %v521_v50 }
  0x83   : > { %650 = vst [vmem:[%s1251_s20 + $0x1d8] sm:$0xff] %v522_v51  ;;  %v524_v59 = vmul.f32 %v396_v56, %v268_v54  ;;  %v525_v60 = vmul.f32 %v397_v58, %v269_v57  ;;  %v270_v61 = vld [vmem:[%s1229_s3 + $0x1f8] sm:$0xff]  ;;  %v271_v63 = vld [vmem:[%s1229_s3 + $0x200] sm:$0xff]  ;;  %v272_v2 = vld [vmem:[%s1229_s3 + $0x208] sm:$0xff] }
  0x84   : > { %v398_v62 = vld [vmem:[%s1236_s29 + $0x1f8] sm:$0xff]  ;;  %651 = vst [vmem:[%s1251_s20 + $0x1e0] sm:$0xff] %v523_v55  ;;  %v399_v1 = vld [vmem:[%s1236_s29 + $0x200] sm:$0xff]  ;;  %v400_v3 = vld [vmem:[%s1236_s29 + $0x208] sm:$0xff] }
  0x85   : > { %v526_v0 = vmul.f32 %v398_v62, %v270_v61  ;;  %652 = vst [vmem:[%s1251_s20 + $0x1e8] sm:$0xff] %v524_v59  ;;  %653 = vst [vmem:[%s1251_s20 + $0x1f0] sm:$0xff] %v525_v60  ;;  %v527_v4 = vmul.f32 %v399_v1, %v271_v63  ;;  %v528_v5 = vmul.f32 %v400_v3, %v272_v2  ;;  %v273_v6 = vld [vmem:[%s1229_s3 + $0x210] sm:$0xff]  ;;  %v274_v8 = vld [vmem:[%s1229_s3 + $0x218] sm:$0xff] }
  0x86   : > { %v401_v7 = vld [vmem:[%s1236_s29 + $0x210] sm:$0xff]  ;;  %v402_v10 = vld [vmem:[%s1236_s29 + $0x218] sm:$0xff]  ;;  %v275_v11 = vld [vmem:[%s1229_s3 + $0x220] sm:$0xff] }
  0x87   : > { %654 = vst [vmem:[%s1251_s20 + $0x1f8] sm:$0xff] %v526_v0  ;;  %v529_v9 = vmul.f32 %v401_v7, %v273_v6  ;;  %v403_v12 = vld [vmem:[%s1236_s29 + $0x220] sm:$0xff]  ;;  %655 = vst [vmem:[%s1251_s20 + $0x200] sm:$0xff] %v527_v4  ;;  %v530_v13 = vmul.f32 %v402_v10, %v274_v8  ;;  %v276_v15 = vld [vmem:[%s1229_s3 + $0x228] sm:$0xff] }
  0x88   : > { %656 = vst [vmem:[%s1251_s20 + $0x208] sm:$0xff] %v528_v5  ;;  %v531_v14 = vmul.f32 %v403_v12, %v275_v11  ;;  %v404_v16 = vld [vmem:[%s1236_s29 + $0x228] sm:$0xff]  ;;  %v277_v17 = vld [vmem:[%s1229_s3 + $0x230] sm:$0xff]  ;;  %v278_v20 = vld [vmem:[%s1229_s3 + $0x238] sm:$0xff] }
  0x89   : > { %657 = vst [vmem:[%s1251_s20 + $0x210] sm:$0xff] %v529_v9  ;;  %v532_v18 = vmul.f32 %v404_v16, %v276_v15  ;;  %v405_v19 = vld [vmem:[%s1236_s29 + $0x230] sm:$0xff]  ;;  %v406_v21 = vld [vmem:[%s1236_s29 + $0x238] sm:$0xff]  ;;  %658 = vst [vmem:[%s1251_s20 + $0x218] sm:$0xff] %v530_v13 }
  0x8a   : > { %659 = vst [vmem:[%s1251_s20 + $0x220] sm:$0xff] %v531_v14  ;;  %v533_v22 = vmul.f32 %v405_v19, %v277_v17  ;;  %v534_v23 = vmul.f32 %v406_v21, %v278_v20  ;;  %v279_v24 = vld [vmem:[%s1229_s3 + $0x240] sm:$0xff]  ;;  %v280_v26 = vld [vmem:[%s1229_s3 + $0x248] sm:$0xff]  ;;  %v281_v29 = vld [vmem:[%s1229_s3 + $0x250] sm:$0xff] }
  0x8b   : > { %v407_v25 = vld [vmem:[%s1236_s29 + $0x240] sm:$0xff]  ;;  %660 = vst [vmem:[%s1251_s20 + $0x228] sm:$0xff] %v532_v18  ;;  %v408_v28 = vld [vmem:[%s1236_s29 + $0x248] sm:$0xff]  ;;  %v409_v30 = vld [vmem:[%s1236_s29 + $0x250] sm:$0xff] }
  0x8c   : > { %v535_v27 = vmul.f32 %v407_v25, %v279_v24  ;;  %661 = vst [vmem:[%s1251_s20 + $0x230] sm:$0xff] %v533_v22  ;;  %662 = vst [vmem:[%s1251_s20 + $0x238] sm:$0xff] %v534_v23  ;;  %v536_v31 = vmul.f32 %v408_v28, %v280_v26  ;;  %v537_v32 = vmul.f32 %v409_v30, %v281_v29  ;;  %v282_v33 = vld [vmem:[%s1229_s3 + $0x258] sm:$0xff]  ;;  %v283_v35 = vld [vmem:[%s1229_s3 + $0x260] sm:$0xff] }
  0x8d   : > { %v410_v34 = vld [vmem:[%s1236_s29 + $0x258] sm:$0xff]  ;;  %v411_v37 = vld [vmem:[%s1236_s29 + $0x260] sm:$0xff]  ;;  %v284_v38 = vld [vmem:[%s1229_s3 + $0x268] sm:$0xff] }
  0x8e   : > { %663 = vst [vmem:[%s1251_s20 + $0x240] sm:$0xff] %v535_v27  ;;  %v538_v36 = vmul.f32 %v410_v34, %v282_v33  ;;  %v412_v39 = vld [vmem:[%s1236_s29 + $0x268] sm:$0xff]  ;;  %664 = vst [vmem:[%s1251_s20 + $0x248] sm:$0xff] %v536_v31  ;;  %v539_v40 = vmul.f32 %v411_v37, %v283_v35  ;;  %v285_v42 = vld [vmem:[%s1229_s3 + $0x270] sm:$0xff] }
  0x8f   : > { %665 = vst [vmem:[%s1251_s20 + $0x250] sm:$0xff] %v537_v32  ;;  %v540_v41 = vmul.f32 %v412_v39, %v284_v38  ;;  %v413_v43 = vld [vmem:[%s1236_s29 + $0x270] sm:$0xff]  ;;  %v286_v44 = vld [vmem:[%s1229_s3 + $0x278] sm:$0xff]  ;;  %v287_v47 = vld [vmem:[%s1229_s3 + $0x280] sm:$0xff] }
  0x90   : > { %666 = vst [vmem:[%s1251_s20 + $0x258] sm:$0xff] %v538_v36  ;;  %v541_v45 = vmul.f32 %v413_v43, %v285_v42  ;;  %v414_v46 = vld [vmem:[%s1236_s29 + $0x278] sm:$0xff]  ;;  %v415_v48 = vld [vmem:[%s1236_s29 + $0x280] sm:$0xff]  ;;  %667 = vst [vmem:[%s1251_s20 + $0x260] sm:$0xff] %v539_v40 }
  0x91   : > { %668 = vst [vmem:[%s1251_s20 + $0x268] sm:$0xff] %v540_v41  ;;  %v542_v49 = vmul.f32 %v414_v46, %v286_v44  ;;  %v543_v50 = vmul.f32 %v415_v48, %v287_v47  ;;  %v288_v51 = vld [vmem:[%s1229_s3 + $0x288] sm:$0xff]  ;;  %v289_v53 = vld [vmem:[%s1229_s3 + $0x290] sm:$0xff]  ;;  %v290_v56 = vld [vmem:[%s1229_s3 + $0x298] sm:$0xff] }
  0x92   : > { %v416_v52 = vld [vmem:[%s1236_s29 + $0x288] sm:$0xff]  ;;  %669 = vst [vmem:[%s1251_s20 + $0x270] sm:$0xff] %v541_v45  ;;  %v417_v55 = vld [vmem:[%s1236_s29 + $0x290] sm:$0xff]  ;;  %v418_v57 = vld [vmem:[%s1236_s29 + $0x298] sm:$0xff] }
  0x93   : > { %v544_v54 = vmul.f32 %v416_v52, %v288_v51  ;;  %670 = vst [vmem:[%s1251_s20 + $0x278] sm:$0xff] %v542_v49  ;;  %671 = vst [vmem:[%s1251_s20 + $0x280] sm:$0xff] %v543_v50  ;;  %v545_v58 = vmul.f32 %v417_v55, %v289_v53  ;;  %v546_v59 = vmul.f32 %v418_v57, %v290_v56  ;;  %v291_v60 = vld [vmem:[%s1229_s3 + $0x2a0] sm:$0xff]  ;;  %v292_v62 = vld [vmem:[%s1229_s3 + $0x2a8] sm:$0xff] }
  0x94   : > { %v419_v61 = vld [vmem:[%s1236_s29 + $0x2a0] sm:$0xff]  ;;  %v420_v0 = vld [vmem:[%s1236_s29 + $0x2a8] sm:$0xff]  ;;  %v293_v1 = vld [vmem:[%s1229_s3 + $0x2b0] sm:$0xff] }
  0x95   : > { %672 = vst [vmem:[%s1251_s20 + $0x288] sm:$0xff] %v544_v54  ;;  %v547_v63 = vmul.f32 %v419_v61, %v291_v60  ;;  %v421_v2 = vld [vmem:[%s1236_s29 + $0x2b0] sm:$0xff]  ;;  %673 = vst [vmem:[%s1251_s20 + $0x290] sm:$0xff] %v545_v58  ;;  %v548_v3 = vmul.f32 %v420_v0, %v292_v62  ;;  %v294_v5 = vld [vmem:[%s1229_s3 + $0x2b8] sm:$0xff] }
  0x96   : > { %674 = vst [vmem:[%s1251_s20 + $0x298] sm:$0xff] %v546_v59  ;;  %v549_v4 = vmul.f32 %v421_v2, %v293_v1  ;;  %v422_v6 = vld [vmem:[%s1236_s29 + $0x2b8] sm:$0xff]  ;;  %v295_v7 = vld [vmem:[%s1229_s3 + $0x2c0] sm:$0xff]  ;;  %v296_v10 = vld [vmem:[%s1229_s3 + $0x2c8] sm:$0xff] }
  0x97   : > { %675 = vst [vmem:[%s1251_s20 + $0x2a0] sm:$0xff] %v547_v63  ;;  %v550_v8 = vmul.f32 %v422_v6, %v294_v5  ;;  %v423_v9 = vld [vmem:[%s1236_s29 + $0x2c0] sm:$0xff]  ;;  %v424_v11 = vld [vmem:[%s1236_s29 + $0x2c8] sm:$0xff]  ;;  %676 = vst [vmem:[%s1251_s20 + $0x2a8] sm:$0xff] %v548_v3 }
  0x98   : > { %677 = vst [vmem:[%s1251_s20 + $0x2b0] sm:$0xff] %v549_v4  ;;  %v551_v12 = vmul.f32 %v423_v9, %v295_v7  ;;  %v552_v13 = vmul.f32 %v424_v11, %v296_v10  ;;  %v297_v14 = vld [vmem:[%s1229_s3 + $0x2d0] sm:$0xff]  ;;  %v298_v16 = vld [vmem:[%s1229_s3 + $0x2d8] sm:$0xff]  ;;  %v299_v19 = vld [vmem:[%s1229_s3 + $0x2e0] sm:$0xff] }
  0x99   : > { %v425_v15 = vld [vmem:[%s1236_s29 + $0x2d0] sm:$0xff]  ;;  %678 = vst [vmem:[%s1251_s20 + $0x2b8] sm:$0xff] %v550_v8  ;;  %v426_v18 = vld [vmem:[%s1236_s29 + $0x2d8] sm:$0xff]  ;;  %v427_v20 = vld [vmem:[%s1236_s29 + $0x2e0] sm:$0xff] }
  0x9a   : > { %v553_v17 = vmul.f32 %v425_v15, %v297_v14  ;;  %679 = vst [vmem:[%s1251_s20 + $0x2c0] sm:$0xff] %v551_v12  ;;  %680 = vst [vmem:[%s1251_s20 + $0x2c8] sm:$0xff] %v552_v13  ;;  %v554_v21 = vmul.f32 %v426_v18, %v298_v16  ;;  %v555_v22 = vmul.f32 %v427_v20, %v299_v19  ;;  %v300_v23 = vld [vmem:[%s1229_s3 + $0x2e8] sm:$0xff]  ;;  %v301_v25 = vld [vmem:[%s1229_s3 + $0x2f0] sm:$0xff] }
  0x9b   : > { %v428_v24 = vld [vmem:[%s1236_s29 + $0x2e8] sm:$0xff]  ;;  %v429_v27 = vld [vmem:[%s1236_s29 + $0x2f0] sm:$0xff]  ;;  %v302_v28 = vld [vmem:[%s1229_s3 + $0x2f8] sm:$0xff] }
  0x9c   : > { %681 = vst [vmem:[%s1251_s20 + $0x2d0] sm:$0xff] %v553_v17  ;;  %v556_v26 = vmul.f32 %v428_v24, %v300_v23  ;;  %v430_v29 = vld [vmem:[%s1236_s29 + $0x2f8] sm:$0xff]  ;;  %682 = vst [vmem:[%s1251_s20 + $0x2d8] sm:$0xff] %v554_v21  ;;  %v557_v30 = vmul.f32 %v429_v27, %v301_v25  ;;  %v303_v32 = vld [vmem:[%s1229_s3 + $0x300] sm:$0xff] }
  0x9d   : > { %683 = vst [vmem:[%s1251_s20 + $0x2e0] sm:$0xff] %v555_v22  ;;  %v558_v31 = vmul.f32 %v430_v29, %v302_v28  ;;  %v431_v33 = vld [vmem:[%s1236_s29 + $0x300] sm:$0xff]  ;;  %v304_v34 = vld [vmem:[%s1229_s3 + $0x308] sm:$0xff]  ;;  %v305_v37 = vld [vmem:[%s1229_s3 + $0x310] sm:$0xff] }
  0x9e   : > { %684 = vst [vmem:[%s1251_s20 + $0x2e8] sm:$0xff] %v556_v26  ;;  %v559_v35 = vmul.f32 %v431_v33, %v303_v32  ;;  %v432_v36 = vld [vmem:[%s1236_s29 + $0x308] sm:$0xff]  ;;  %v433_v38 = vld [vmem:[%s1236_s29 + $0x310] sm:$0xff]  ;;  %685 = vst [vmem:[%s1251_s20 + $0x2f0] sm:$0xff] %v557_v30 }
  0x9f   : > { %686 = vst [vmem:[%s1251_s20 + $0x2f8] sm:$0xff] %v558_v31  ;;  %v560_v39 = vmul.f32 %v432_v36, %v304_v34  ;;  %v561_v40 = vmul.f32 %v433_v38, %v305_v37  ;;  %v306_v41 = vld [vmem:[%s1229_s3 + $0x318] sm:$0xff]  ;;  %v307_v43 = vld [vmem:[%s1229_s3 + $0x320] sm:$0xff]  ;;  %v308_v46 = vld [vmem:[%s1229_s3 + $0x328] sm:$0xff] }
  0xa0   : > { %v434_v42 = vld [vmem:[%s1236_s29 + $0x318] sm:$0xff]  ;;  %687 = vst [vmem:[%s1251_s20 + $0x300] sm:$0xff] %v559_v35  ;;  %v435_v45 = vld [vmem:[%s1236_s29 + $0x320] sm:$0xff]  ;;  %v436_v47 = vld [vmem:[%s1236_s29 + $0x328] sm:$0xff] }
  0xa1   : > { %v562_v44 = vmul.f32 %v434_v42, %v306_v41  ;;  %688 = vst [vmem:[%s1251_s20 + $0x308] sm:$0xff] %v560_v39  ;;  %689 = vst [vmem:[%s1251_s20 + $0x310] sm:$0xff] %v561_v40  ;;  %v563_v48 = vmul.f32 %v435_v45, %v307_v43  ;;  %v564_v49 = vmul.f32 %v436_v47, %v308_v46  ;;  %v309_v50 = vld [vmem:[%s1229_s3 + $0x330] sm:$0xff]  ;;  %v310_v52 = vld [vmem:[%s1229_s3 + $0x338] sm:$0xff] }
  0xa2   : > { %v437_v51 = vld [vmem:[%s1236_s29 + $0x330] sm:$0xff]  ;;  %v438_v54 = vld [vmem:[%s1236_s29 + $0x338] sm:$0xff]  ;;  %v311_v55 = vld [vmem:[%s1229_s3 + $0x340] sm:$0xff] }
  0xa3   : > { %690 = vst [vmem:[%s1251_s20 + $0x318] sm:$0xff] %v562_v44  ;;  %v565_v53 = vmul.f32 %v437_v51, %v309_v50  ;;  %v439_v56 = vld [vmem:[%s1236_s29 + $0x340] sm:$0xff]  ;;  %691 = vst [vmem:[%s1251_s20 + $0x320] sm:$0xff] %v563_v48  ;;  %v566_v57 = vmul.f32 %v438_v54, %v310_v52  ;;  %v312_v59 = vld [vmem:[%s1229_s3 + $0x348] sm:$0xff] }
  0xa4   : > { %692 = vst [vmem:[%s1251_s20 + $0x328] sm:$0xff] %v564_v49  ;;  %v567_v58 = vmul.f32 %v439_v56, %v311_v55  ;;  %v440_v60 = vld [vmem:[%s1236_s29 + $0x348] sm:$0xff]  ;;  %v313_v61 = vld [vmem:[%s1229_s3 + $0x350] sm:$0xff]  ;;  %v314_v0 = vld [vmem:[%s1229_s3 + $0x358] sm:$0xff] }
  0xa5   : > { %693 = vst [vmem:[%s1251_s20 + $0x330] sm:$0xff] %v565_v53  ;;  %v568_v62 = vmul.f32 %v440_v60, %v312_v59  ;;  %v441_v63 = vld [vmem:[%s1236_s29 + $0x350] sm:$0xff]  ;;  %v442_v1 = vld [vmem:[%s1236_s29 + $0x358] sm:$0xff]  ;;  %694 = vst [vmem:[%s1251_s20 + $0x338] sm:$0xff] %v566_v57 }
  0xa6   : > { %695 = vst [vmem:[%s1251_s20 + $0x340] sm:$0xff] %v567_v58  ;;  %v569_v2 = vmul.f32 %v441_v63, %v313_v61  ;;  %v570_v3 = vmul.f32 %v442_v1, %v314_v0  ;;  %v315_v4 = vld [vmem:[%s1229_s3 + $0x360] sm:$0xff]  ;;  %v316_v6 = vld [vmem:[%s1229_s3 + $0x368] sm:$0xff]  ;;  %v317_v9 = vld [vmem:[%s1229_s3 + $0x370] sm:$0xff] }
  0xa7   : > { %v443_v5 = vld [vmem:[%s1236_s29 + $0x360] sm:$0xff]  ;;  %696 = vst [vmem:[%s1251_s20 + $0x348] sm:$0xff] %v568_v62  ;;  %v444_v8 = vld [vmem:[%s1236_s29 + $0x368] sm:$0xff]  ;;  %v445_v10 = vld [vmem:[%s1236_s29 + $0x370] sm:$0xff] }
  0xa8   : > { %v571_v7 = vmul.f32 %v443_v5, %v315_v4  ;;  %697 = vst [vmem:[%s1251_s20 + $0x350] sm:$0xff] %v569_v2  ;;  %698 = vst [vmem:[%s1251_s20 + $0x358] sm:$0xff] %v570_v3  ;;  %v572_v11 = vmul.f32 %v444_v8, %v316_v6  ;;  %v573_v12 = vmul.f32 %v445_v10, %v317_v9  ;;  %v318_v13 = vld [vmem:[%s1229_s3 + $0x378] sm:$0xff]  ;;  %v319_v15 = vld [vmem:[%s1229_s3 + $0x380] sm:$0xff] }
  0xa9   : > { %v446_v14 = vld [vmem:[%s1236_s29 + $0x378] sm:$0xff]  ;;  %v447_v17 = vld [vmem:[%s1236_s29 + $0x380] sm:$0xff]  ;;  %v320_v18 = vld [vmem:[%s1229_s3 + $0x388] sm:$0xff] }
  0xaa   : > { %699 = vst [vmem:[%s1251_s20 + $0x360] sm:$0xff] %v571_v7  ;;  %v574_v16 = vmul.f32 %v446_v14, %v318_v13  ;;  %v448_v19 = vld [vmem:[%s1236_s29 + $0x388] sm:$0xff]  ;;  %700 = vst [vmem:[%s1251_s20 + $0x368] sm:$0xff] %v572_v11  ;;  %v575_v20 = vmul.f32 %v447_v17, %v319_v15  ;;  %v321_v22 = vld [vmem:[%s1229_s3 + $0x390] sm:$0xff] }
  0xab   : > { %701 = vst [vmem:[%s1251_s20 + $0x370] sm:$0xff] %v573_v12  ;;  %v576_v21 = vmul.f32 %v448_v19, %v320_v18  ;;  %v449_v23 = vld [vmem:[%s1236_s29 + $0x390] sm:$0xff]  ;;  %v322_v24 = vld [vmem:[%s1229_s3 + $0x398] sm:$0xff]  ;;  %v323_v27 = vld [vmem:[%s1229_s3 + $0x3a0] sm:$0xff] }
  0xac   : > { %702 = vst [vmem:[%s1251_s20 + $0x378] sm:$0xff] %v574_v16  ;;  %v577_v25 = vmul.f32 %v449_v23, %v321_v22  ;;  %v450_v26 = vld [vmem:[%s1236_s29 + $0x398] sm:$0xff]  ;;  %v451_v28 = vld [vmem:[%s1236_s29 + $0x3a0] sm:$0xff]  ;;  %703 = vst [vmem:[%s1251_s20 + $0x380] sm:$0xff] %v575_v20 }
  0xad   : > { %704 = vst [vmem:[%s1251_s20 + $0x388] sm:$0xff] %v576_v21  ;;  %v578_v29 = vmul.f32 %v450_v26, %v322_v24  ;;  %v579_v30 = vmul.f32 %v451_v28, %v323_v27  ;;  %v324_v31 = vld [vmem:[%s1229_s3 + $0x3a8] sm:$0xff]  ;;  %v325_v33 = vld [vmem:[%s1229_s3 + $0x3b0] sm:$0xff]  ;;  %v326_v36 = vld [vmem:[%s1229_s3 + $0x3b8] sm:$0xff] }
  0xae   : > { %v452_v32 = vld [vmem:[%s1236_s29 + $0x3a8] sm:$0xff]  ;;  %705 = vst [vmem:[%s1251_s20 + $0x390] sm:$0xff] %v577_v25  ;;  %v453_v35 = vld [vmem:[%s1236_s29 + $0x3b0] sm:$0xff]  ;;  %v454_v37 = vld [vmem:[%s1236_s29 + $0x3b8] sm:$0xff] }
  0xaf   : > { %v580_v34 = vmul.f32 %v452_v32, %v324_v31  ;;  %706 = vst [vmem:[%s1251_s20 + $0x398] sm:$0xff] %v578_v29  ;;  %707 = vst [vmem:[%s1251_s20 + $0x3a0] sm:$0xff] %v579_v30  ;;  %v581_v38 = vmul.f32 %v453_v35, %v325_v33  ;;  %v582_v39 = vmul.f32 %v454_v37, %v326_v36  ;;  %v327_v40 = vld [vmem:[%s1229_s3 + $0x3c0] sm:$0xff]  ;;  %v328_v42 = vld [vmem:[%s1229_s3 + $0x3c8] sm:$0xff] }
  0xb0   : > { %v455_v41 = vld [vmem:[%s1236_s29 + $0x3c0] sm:$0xff]  ;;  %v456_v44 = vld [vmem:[%s1236_s29 + $0x3c8] sm:$0xff]  ;;  %v329_v45 = vld [vmem:[%s1229_s3 + $0x3d0] sm:$0xff] }
  0xb1   : > { %708 = vst [vmem:[%s1251_s20 + $0x3a8] sm:$0xff] %v580_v34  ;;  %v583_v43 = vmul.f32 %v455_v41, %v327_v40  ;;  %v457_v46 = vld [vmem:[%s1236_s29 + $0x3d0] sm:$0xff]  ;;  %709 = vst [vmem:[%s1251_s20 + $0x3b0] sm:$0xff] %v581_v38  ;;  %v584_v47 = vmul.f32 %v456_v44, %v328_v42  ;;  %v330_v49 = vld [vmem:[%s1229_s3 + $0x3d8] sm:$0xff] }
  0xb2   : > { %710 = vst [vmem:[%s1251_s20 + $0x3b8] sm:$0xff] %v582_v39  ;;  %v585_v48 = vmul.f32 %v457_v46, %v329_v45  ;;  %v458_v50 = vld [vmem:[%s1236_s29 + $0x3d8] sm:$0xff]  ;;  %v331_v51 = vld [vmem:[%s1229_s3 + $0x3e0] sm:$0xff]  ;;  %v332_v54 = vld [vmem:[%s1229_s3 + $0x3e8] sm:$0xff] }
  0xb3   : > { %711 = vst [vmem:[%s1251_s20 + $0x3c0] sm:$0xff] %v583_v43  ;;  %v586_v52 = vmul.f32 %v458_v50, %v330_v49  ;;  %v459_v53 = vld [vmem:[%s1236_s29 + $0x3e0] sm:$0xff]  ;;  %v460_v55 = vld [vmem:[%s1236_s29 + $0x3e8] sm:$0xff]  ;;  %712 = vst [vmem:[%s1251_s20 + $0x3c8] sm:$0xff] %v584_v47 }
  0xb4   : > { %713 = vst [vmem:[%s1251_s20 + $0x3d0] sm:$0xff] %v585_v48  ;;  %v587_v56 = vmul.f32 %v459_v53, %v331_v51  ;;  %v588_v57 = vmul.f32 %v460_v55, %v332_v54  ;;  %v333_v58 = vld [vmem:[%s1229_s3 + $0x3f0] sm:$0xff]  ;;  %v334_v60 = vld [vmem:[%s1229_s3 + $0x3f8] sm:$0xff] }
  0xb5   : > { %v461_v59 = vld [vmem:[%s1236_s29 + $0x3f0] sm:$0xff]  ;;  %714 = vst [vmem:[%s1251_s20 + $0x3d8] sm:$0xff] %v586_v52  ;;  %v462_v62 = vld [vmem:[%s1236_s29 + $0x3f8] sm:$0xff] }
  0xb6   : > { %v589_v61 = vmul.f32 %v461_v59, %v333_v58  ;;  %715 = vst [vmem:[%s1251_s20 + $0x3e0] sm:$0xff] %v587_v56  ;;  %716 = vst [vmem:[%s1251_s20 + $0x3e8] sm:$0xff] %v588_v57  ;;  %v590_v63 = vmul.f32 %v462_v62, %v334_v60 }
  0xb8   : > { %717 = vst [vmem:[%s1251_s20 + $0x3f0] sm:$0xff] %v589_v61  ;;  %718 = vst [vmem:[%s1251_s20 + $0x3f8] sm:$0xff] %v590_v63 }
  0xb9   : > { %985 = shalt.err (!%p982_p11)
}
  0xba   : > { %s986_s7 = scalar_lea.hbm %s1629_s17, 16384  ;;  %s990_s4 = scalar_lea.hbm %s1680_s2, 49152 }
  0xbb   : > { %p987_p7 = scmp.ne.s32.totalorder %s1629_s17, %s986_s7  ;;  %p991_p1 = scmp.lt.u32.totalorder %s1629_s17, %s1680_s2 }
  0xbc   : > { %p992_p3 = scmp.lt.u32.totalorder %s990_s4, %s986_s7  ;;  %p994_p12 = scmp.lt.u32.totalorder %s986_s7, %s1629_s17 }
  0xbd   : > { %p988_p8 = pnand %p987_p7, %p1690_p0 }
  0xbe   : > { %p993_p6 = por %p992_p3, %p991_p1 }
  0xbf   : > { %p989_p13 = pneg %p988_p8 }
  0xc0   : > { %p995_p2 = por %p994_p12, %p993_p6 }
  0xc2   : > { %p996_p9 = pnand %p995_p2, %p989_p13 }
  0xc4   : > { %999 = shalt.err (!%p996_p9)
}
  0xc5   : > { %s1049_s23 = smov 512   ;;  %s1050_s29 = smov 32  }
  0xc6   : > { %861 = dma.vmem_to_hbm [thread:$0]  (%p1690_p0), %s1631_s6, 16384, %s1629_s17, %s720_s28, %s1049_s23, %s1049_s23, %s1050_s29  }
  0xc7 PF: > { %p875_p4 = scmp.ge.s32.totalorder %s1042_s12, 2  ;;  %s749_s20 = sand.u32 1, %s1030_s9  }
  0xc8   : > { %p1691_p5 = scmp.ne.s32.totalorder %s1686_s22, 0  ;;  %s750_s5 = scalar_lea.sflag [#allocation4], %s749_s20 }
  0xca   : > { %p871_p10 = pnand %p875_p4, %p1691_p5 }
  0xcc   : > { %1025 = dma.done.wait (!%p871_p10), %s750_s5, 16384  }
  0xcd   : > { %1027 = vsyncadd (!%p871_p10), %s750_s5, 4294950912  ;;  %p18_p11 = scmp.ge.s32.totalorder %s1091_s15, 5   ;;  %s1692_s9 = smov %s1034_s10 }
  0xce   : > { %s1693_s10 = smov %s1038_s11  ;;  %s1694_s11 = smov %s1103_s18 }
  0xcf   : > { %s1695_s12 = smov %s1091_s15  ;;  %20 = sbr.rel (!%p18_p11) target bundleno = 7 (0x7), region = 86 }
  0xd6   :  { %755 = vsyncpa [#allocation3], 1 }
  0xd7   :  { %757 = vsyncpa [#allocation3 + $0x1], 1 }
  0xd8   :  { %758 = vsyncpa [#allocation6], 1 }
  0xd9   :  { %760 = vsyncpa [#allocation6 + $0x1], 1 }
  0xda   :  { %761 = vsyncpa [#allocation4], 1 }
  0xdb   :  { %763 = vsyncpa [#allocation4 + $0x1], 1 }

</bundles_post_ra>
